<compile_context>
chip_gen: v7x
topology: tpu7x:2x2x1
jax: 0.10.0
libtpu: 0.0.40
codegen_flags: <defaults>
</compile_context>

<pallas_src>
import functools

import jax
import jax.numpy as jnp
from jax import lax
from jax.experimental import pallas as pl
from jax.experimental.pallas import tpu as pltpu


def _round_up(n, m):
    return ((n + m - 1) // m) * m


# ----------------------------------------------------------------------------
# Fused kernel: bidirectional LSTM last-step features + all per-task FC heads
# ----------------------------------------------------------------------------
def net_kernel(x2d_ref,    # (T*Bp, I)      time-major, batch padded to Bp (sublane granule)
               wih_ref,    # (I, 8H)        [W_ih_fwd^T | W_ih_bwd^T]
               b_ref,      # (1, 8H)        [b_ih_f + b_hh_f | b_ih_b + b_hh_b]
               whh_ref,    # (H, 4H)        forward W_hh^T
               w1f_ref,    # (H, NT*128)    fc1 weights^T, forward-direction rows
               w1b_ref,    # (H, NT*128)    fc1 weights^T, backward-direction rows
               b1_ref,     # (1, NT*128)
               w2_ref,     # (NT, 128, 128) per-task fc2 weights^T, output cols padded to 128
               b2_ref,     # (1, NT*128)    per-task fc2 bias, padded to 128 lanes per task
               out_ref):   # (Bp, NT*128)   lane-dense output (task blocks of 128 lanes)
    H = whh_ref.shape[0]
    Bp = out_ref.shape[0]
    T = x2d_ref.shape[0] // Bp
    NT, F1, FP = w2_ref.shape

    def mdot(a, w):
        # cast activations to the (possibly bf16) weight dtype -> native MXU path,
        # f32 accumulation either way
        return jnp.dot(a.astype(w.dtype), w, preferred_element_type=jnp.float32)

    # Input projection for both directions, hoisted out of the recurrence:
    # one (T*Bp, I) x (I, 8H) matmul instead of per-step (Bp, I) matmuls.
    xproj = mdot(x2d_ref[...], wih_ref[...]) + b_ref[...]            # (T*Bp, 8H) f32

    def cell(gates, c_prev):
        # Full-vreg transcendentals: one sigmoid and one tanh over all 4H lanes
        # (2 EUP pushes per step), then pick up the gate columns.
        sig = jax.nn.sigmoid(gates)                                   # (Bp, 4H)
        th = jnp.tanh(gates)                                          # (Bp, 4H)
        i = sig[:, 0 * H:1 * H]
        g = th[:, 2 * H:3 * H]
        o = sig[:, 3 * H:4 * H]
        if c_prev is None:                    # zero initial cell state: f * 0 == 0
            c_new = i * g
        else:
            f = sig[:, 1 * H:2 * H]
            c_new = f * c_prev + i * g
        return o * jnp.tanh(c_new), c_new

    whh = whh_ref[...]

    # ---- forward direction, fully unrolled (T static & small) ---------------
    # t = 0: h0 = c0 = 0, so the gates are just the precomputed input projection.
    h, c = cell(xproj[0:Bp, 0:4 * H], None)
    for t in range(1, T):
        gates = xproj[t * Bp:(t + 1) * Bp, 0:4 * H] + mdot(h, whh)
        h, c = cell(gates, c)
    h_fwd = h                                                         # (Bp, H)

    # ---- backward direction --------------------------------------------------
    # out[:, -1, H:] is the backward LSTM's state after processing only x[T-1]
    # from zero init, so no W_hh_bwd matmul is needed at all.
    h_bwd, _ = cell(xproj[(T - 1) * Bp:T * Bp, 4 * H:8 * H], None)    # (Bp, H)

    # ---- stacked fc1 (no lane concat: one dot per direction) -----------------
    inter = (mdot(h_fwd, w1f_ref[...]) + mdot(h_bwd, w1b_ref[...])
             + b1_ref[...])                                           # (Bp, NT*128)

    # ---- per-task fc2: lane-dense 128-wide output blocks ----------------------
    for i in range(NT):
        blk = (mdot(inter[:, i * F1:(i + 1) * F1], w2_ref[i])
               + b2_ref[:, i * FP:(i + 1) * FP])                      # (Bp, 128)
        out_ref[:, i * FP:(i + 1) * FP] = blk


# ----------------------------------------------------------------------------
# One-time parameter packing (done at init, not per forward call)
# ----------------------------------------------------------------------------
def prepare_params(params, weights_dtype=jnp.float32):
    # weights_dtype=jnp.bfloat16 halves weight HBM->VMEM DMA at scale (activations and
    # accumulation stay f32); default f32 keeps the 1e-4 check vs the f32 reference.
    (wih_f, whh_f, bih_f, bhh_f,
     wih_b, whh_b, bih_b, bhh_b,          # whh_b unused; bhh_b only via the bias sum
     w1, b1, w2, b2) = params
    H = whh_f.shape[1]
    NT, F1, H2 = w1.shape                 # (num_tasks, 128, 2H)
    O = w2.shape[1]
    FP = 128                              # lane-dense per-task fc2 output block

    wih_both = jnp.concatenate([wih_f.T, wih_b.T], axis=1).astype(weights_dtype)   # (I, 8H)
    b_both = jnp.concatenate([bih_f + bhh_f, bih_b + bhh_b]).reshape(1, 8 * H)
    b_both = b_both.astype(jnp.float32)
    whh_fT = whh_f.T.astype(weights_dtype)                                          # (H, 4H)

    # fc1 split by direction -> removes the in-kernel lane concat of [h_fwd | h_bwd]
    w1_fwd = jnp.transpose(w1[:, :, :H], (2, 0, 1)).reshape(H, NT * F1).astype(weights_dtype)
    w1_bwd = jnp.transpose(w1[:, :, H:], (2, 0, 1)).reshape(H, NT * F1).astype(weights_dtype)
    b1_all = b1.reshape(1, NT * F1).astype(jnp.float32)

    # fc2 per task, output columns zero-padded to 128 lanes (lane-dense stores,
    # FLOPs/VMEM stay linear in NT — no block-diagonal zero matrix)
    w2_pad = jnp.pad(jnp.transpose(w2, (0, 2, 1)),
                     ((0, 0), (0, 0), (0, FP - O))).astype(weights_dtype)            # (NT,128,128)
    b2_pad = jnp.pad(b2, ((0, 0), (0, FP - O))).reshape(1, NT * FP).astype(jnp.float32)

    return (wih_both, b_both, whh_fT, w1_fwd, w1_bwd, b1_all, w2_pad, b2_pad)


# ----------------------------------------------------------------------------
# Forward wrapper
# ----------------------------------------------------------------------------
@functools.partial(jax.jit, static_argnames=("output_size",))
def net_forward(x, packed, *, output_size):
    """x: (B, T, I) float32, packed = prepare_params(...)  ->  (NT, B, O) float32."""
    wih_both, b_both, whh_fT, w1_fwd, w1_bwd, b1_all, w2_pad, b2_pad = packed
    B, T, I = x.shape
    H = whh_fT.shape[0]
    NT, F1, FP = w2_pad.shape
    Bp = max(8, _round_up(B, 8))          # pad batch to the 8-sublane granule

    # time-major, batch-padded, flattened: row t*Bp + b == x[b, t, :]
    xt = jnp.transpose(x, (1, 0, 2))                                   # (T, B, I)
    if Bp != B:
        xt = jnp.pad(xt, ((0, 0), (0, Bp - B), (0, 0)))
    x2d = xt.reshape(T * Bp, I).astype(jnp.float32)

    operands = (x2d, wih_both, b_both, whh_fT, w1_fwd, w1_bwd, b1_all, w2_pad, b2_pad)

    flops = 2 * (T * Bp * I * 8 * H            # hoisted input projection
                 + (T - 1) * Bp * H * 4 * H    # recurrence h @ W_hh
                 + 2 * Bp * H * NT * F1        # fc1 (both directions)
                 + NT * Bp * F1 * FP)          # fc2
    transcendentals = (T + 1) * Bp * (2 * 4 * H + H)
    bytes_accessed = (sum(int(a.size) * a.dtype.itemsize for a in operands)
                      + Bp * NT * FP * 4)

    vmem = pl.BlockSpec(memory_space=pltpu.MemorySpace.VMEM)
    y = pl.pallas_call(
        net_kernel,
        out_shape=jax.ShapeDtypeStruct((Bp, NT * FP), jnp.float32),
        in_specs=[vmem] * len(operands),
        out_specs=vmem,
        cost_estimate=pl.CostEstimate(flops=flops,
                                      transcendentals=transcendentals,
                                      bytes_accessed=bytes_accessed),
        compiler_params=pltpu.CompilerParams(vmem_limit_bytes=32 * 1024 * 1024),
    )(*operands)
    # TODO(synk): once B is non-trivial, add a batch-parallel grid axis
    # (dimension_semantics=("parallel",)) so v7x's second TensorCore is used.

    # (Bp, NT*128) -> (NT, B, O); task blocks are already lane-contiguous.
    out = y.reshape(Bp, NT, FP)[:B, :, :output_size]
    return jnp.transpose(out, (1, 0, 2))


# ----------------------------------------------------------------------------
# Pure-JAX reference (mirrors torch.nn.LSTM + the per-task linears)
# ----------------------------------------------------------------------------
def reference(x, params, H):
    (wih_f, whh_f, bih_f, bhh_f,
     wih_b, whh_b, bih_b, bhh_b,
     w1, b1, w2, b2) = params
    B = x.shape[0]

    def run_dir(xs, wih, whh, bih, bhh):
        def cell(carry, x_t):
            h, c = carry
            g = x_t @ wih.T + bih + h @ whh.T + bhh
            i = jax.nn.sigmoid(g[:, :H])
            f = jax.nn.sigmoid(g[:, H:2 * H])
            gg = jnp.tanh(g[:, 2 * H:3 * H])
            o = jax.nn.sigmoid(g[:, 3 * H:])
            c = f * c + i * gg
            h = o * jnp.tanh(c)
            return (h, c), h
        z = jnp.zeros((B, H), jnp.float32)
        _, hs = lax.scan(cell, (z, z), jnp.swapaxes(xs, 0, 1))
        return hs                                           # (T, B, H)

    hs_f = run_dir(x, wih_f, whh_f, bih_f, bhh_f)
    hs_b = run_dir(x[:, ::-1, :], wih_b, whh_b, bih_b, bhh_b)[::-1]
    out_last = jnp.concatenate([hs_f[-1], hs_b[-1]], axis=-1)   # (B, 2H)

    inter = jnp.einsum('bh,tfh->tbf', out_last, w1) + b1[:, None, :]
    outs = jnp.einsum('tbf,tof->tbo', inter, w2) + b2[:, None, :]
    return outs


# ----------------------------------------------------------------------------
if __name__ == "__main__":
    B, T, I, H, O, NT = 2, 8, 16, 32, 4, 3   # batch, seq, input, hidden, output, tasks
    key = jax.random.PRNGKey(0)
    ks = jax.random.split(key, 16)

    def u(k, shape, fan):
        bound = 1.0 / jnp.sqrt(fan)
        return jax.random.uniform(k, shape, jnp.float32, -bound, bound)

    # LSTM params (PyTorch gate order: i, f, g, o)
    wih_f = u(ks[0], (4 * H, I), H)
    whh_f = u(ks[1], (4 * H, H), H)
    bih_f = u(ks[2], (4 * H,), H)
    bhh_f = u(ks[3], (4 * H,), H)
    wih_b = u(ks[4], (4 * H, I), H)
    whh_b = u(ks[5], (4 * H, H), H)
    bih_b = u(ks[6], (4 * H,), H)
    bhh_b = u(ks[7], (4 * H,), H)
    # per-task FC params
    w1 = u(ks[8], (NT, 128, 2 * H), 2 * H)
    b1 = u(ks[9], (NT, 128), 2 * H)
    w2 = u(ks[10], (NT, O, 128), 128)
    b2 = u(ks[11], (NT, O), 128)

    params = (wih_f, whh_f, bih_f, bhh_f,
              wih_b, whh_b, bih_b, bhh_b,
              w1, b1, w2, b2)

    x = jax.random.normal(ks[12], (B, T, I), jnp.float32)

    packed = jax.block_until_ready(prepare_params(params))   # one-time packing
    out = jax.block_until_ready(net_forward(x, packed, output_size=O))
    ref = reference(x, params, H)

    assert out.shape == (NT, B, O), out.shape
    assert jnp.allclose(out, ref, atol=1e-4, rtol=1e-4), \
        float(jnp.max(jnp.abs(out - ref)))
    print("KERNEL_OK")
</pallas_src>

<mosaic_0001>
module attributes {stable_mosaic.version = 11 : i64} {
  func.func @net_kernel(%arg0: memref<64x16xf32, #tpu.memory_space<vmem>>, %arg1: memref<16x256xf32, #tpu.memory_space<vmem>>, %arg2: memref<1x256xf32, #tpu.memory_space<vmem>>, %arg3: memref<32x128xf32, #tpu.memory_space<vmem>>, %arg4: memref<32x384xf32, #tpu.memory_space<vmem>>, %arg5: memref<32x384xf32, #tpu.memory_space<vmem>>, %arg6: memref<1x384xf32, #tpu.memory_space<vmem>>, %arg7: memref<3x128x128xf32, #tpu.memory_space<vmem>>, %arg8: memref<1x384xf32, #tpu.memory_space<vmem>>, %arg9: memref<8x384xf32, #tpu.memory_space<vmem>>) attributes {dimension_semantics = [], scalar_prefetch = 0 : i64, scratch_operands = 0 : i64, tpu.core_type = #tpu.core_type<tc>} {
    %c0 = arith.constant 0 : index
    %c0_0 = arith.constant 0 : index
    %0 = vector.load %arg0[%c0, %c0_0] : memref<64x16xf32, #tpu.memory_space<vmem>>, vector<64x16xf32>
    %c0_1 = arith.constant 0 : index
    %c0_2 = arith.constant 0 : index
    %1 = vector.load %arg1[%c0_1, %c0_2] : memref<16x256xf32, #tpu.memory_space<vmem>>, vector<16x256xf32>
    %cst = arith.constant dense<0.000000e+00> : vector<64x256xf32>
    %2 = tpu.matmul %0, %1, %cst {dimension_numbers = #tpu.dot_dimension_numbers<[1], [0], [0], [1], [0, 0, 1, 1], [], []>} : vector<64x16xf32>, vector<16x256xf32>, vector<64x256xf32> -> vector<64x256xf32>
    %c0_3 = arith.constant 0 : index
    %c0_4 = arith.constant 0 : index
    %3 = vector.load %arg2[%c0_3, %c0_4] : memref<1x256xf32, #tpu.memory_space<vmem>>, vector<1x256xf32>
    %4 = vector.broadcast %3 : vector<1x256xf32> to vector<64x256xf32>
    %5 = arith.addf %2, %4 : vector<64x256xf32>
    %c0_5 = arith.constant 0 : index
    %c0_6 = arith.constant 0 : index
    %6 = vector.load %arg3[%c0_5, %c0_6] : memref<32x128xf32, #tpu.memory_space<vmem>>, vector<32x128xf32>
    %7 = vector.extract_strided_slice %5 {offsets = [0, 0], sizes = [8, 128], strides = [1, 1]} : vector<64x256xf32> to vector<8x128xf32>
    %8 = arith.negf %7 : vector<8x128xf32>
    %9 = math.exp %8 : vector<8x128xf32>
    %cst_7 = arith.constant 1.000000e+00 : f32
    %10 = vector.broadcast %cst_7 : f32 to vector<8x128xf32>
    %11 = arith.addf %10, %9 : vector<8x128xf32>
    %12 = arith.divf %10, %11 : vector<8x128xf32>
    %13 = math.tanh %7 : vector<8x128xf32>
    %14 = vector.extract_strided_slice %12 {offsets = [0, 0], sizes = [8, 32], strides = [1, 1]} : vector<8x128xf32> to vector<8x32xf32>
    %15 = vector.extract_strided_slice %13 {offsets = [0, 64], sizes = [8, 32], strides = [1, 1]} : vector<8x128xf32> to vector<8x32xf32>
    %16 = vector.extract_strided_slice %12 {offsets = [0, 96], sizes = [8, 32], strides = [1, 1]} : vector<8x128xf32> to vector<8x32xf32>
    %17 = arith.mulf %14, %15 : vector<8x32xf32>
    %18 = math.tanh %17 : vector<8x32xf32>
    %19 = arith.mulf %16, %18 : vector<8x32xf32>
    %20 = vector.extract_strided_slice %5 {offsets = [8, 0], sizes = [8, 128], strides = [1, 1]} : vector<64x256xf32> to vector<8x128xf32>
    %cst_8 = arith.constant dense<0.000000e+00> : vector<8x128xf32>
    %21 = tpu.matmul %19, %6, %cst_8 {dimension_numbers = #tpu.dot_dimension_numbers<[1], [0], [0], [1], [0, 0, 1, 1], [], []>} : vector<8x32xf32>, vector<32x128xf32>, vector<8x128xf32> -> vector<8x128xf32>
    %22 = arith.addf %20, %21 : vector<8x128xf32>
    %23 = arith.negf %22 : vector<8x128xf32>
    %24 = math.exp %23 : vector<8x128xf32>
    %cst_9 = arith.constant 1.000000e+00 : f32
    %25 = vector.broadcast %cst_9 : f32 to vector<8x128xf32>
    %26 = arith.addf %25, %24 : vector<8x128xf32>
    %27 = arith.divf %25, %26 : vector<8x128xf32>
    %28 = math.tanh %22 : vector<8x128xf32>
    %29 = vector.extract_strided_slice %27 {offsets = [0, 0], sizes = [8, 32], strides = [1, 1]} : vector<8x128xf32> to vector<8x32xf32>
    %30 = vector.extract_strided_slice %28 {offsets = [0, 64], sizes = [8, 32], strides = [1, 1]} : vector<8x128xf32> to vector<8x32xf32>
    %31 = vector.extract_strided_slice %27 {offsets = [0, 96], sizes = [8, 32], strides = [1, 1]} : vector<8x128xf32> to vector<8x32xf32>
    %32 = vector.extract_strided_slice %27 {offsets = [0, 32], sizes = [8, 32], strides = [1, 1]} : vector<8x128xf32> to vector<8x32xf32>
    %33 = arith.mulf %32, %17 : vector<8x32xf32>
    %34 = arith.mulf %29, %30 : vector<8x32xf32>
    %35 = arith.addf %33, %34 : vector<8x32xf32>
    %36 = math.tanh %35 : vector<8x32xf32>
    %37 = arith.mulf %31, %36 : vector<8x32xf32>
    %38 = vector.extract_strided_slice %5 {offsets = [16, 0], sizes = [8, 128], strides = [1, 1]} : vector<64x256xf32> to vector<8x128xf32>
    %cst_10 = arith.constant dense<0.000000e+00> : vector<8x128xf32>
    %39 = tpu.matmul %37, %6, %cst_10 {dimension_numbers = #tpu.dot_dimension_numbers<[1], [0], [0], [1], [0, 0, 1, 1], [], []>} : vector<8x32xf32>, vector<32x128xf32>, vector<8x128xf32> -> vector<8x128xf32>
    %40 = arith.addf %38, %39 : vector<8x128xf32>
    %41 = arith.negf %40 : vector<8x128xf32>
    %42 = math.exp %41 : vector<8x128xf32>
    %cst_11 = arith.constant 1.000000e+00 : f32
    %43 = vector.broadcast %cst_11 : f32 to vector<8x128xf32>
    %44 = arith.addf %43, %42 : vector<8x128xf32>
    %45 = arith.divf %43, %44 : vector<8x128xf32>
    %46 = math.tanh %40 : vector<8x128xf32>
    %47 = vector.extract_strided_slice %45 {offsets = [0, 0], sizes = [8, 32], strides = [1, 1]} : vector<8x128xf32> to vector<8x32xf32>
    %48 = vector.extract_strided_slice %46 {offsets = [0, 64], sizes = [8, 32], strides = [1, 1]} : vector<8x128xf32> to vector<8x32xf32>
    %49 = vector.extract_strided_slice %45 {offsets = [0, 96], sizes = [8, 32], strides = [1, 1]} : vector<8x128xf32> to vector<8x32xf32>
    %50 = vector.extract_strided_slice %45 {offsets = [0, 32], sizes = [8, 32], strides = [1, 1]} : vector<8x128xf32> to vector<8x32xf32>
    %51 = arith.mulf %50, %35 : vector<8x32xf32>
    %52 = arith.mulf %47, %48 : vector<8x32xf32>
    %53 = arith.addf %51, %52 : vector<8x32xf32>
    %54 = math.tanh %53 : vector<8x32xf32>
    %55 = arith.mulf %49, %54 : vector<8x32xf32>
    %56 = vector.extract_strided_slice %5 {offsets = [24, 0], sizes = [8, 128], strides = [1, 1]} : vector<64x256xf32> to vector<8x128xf32>
    %cst_12 = arith.constant dense<0.000000e+00> : vector<8x128xf32>
    %57 = tpu.matmul %55, %6, %cst_12 {dimension_numbers = #tpu.dot_dimension_numbers<[1], [0], [0], [1], [0, 0, 1, 1], [], []>} : vector<8x32xf32>, vector<32x128xf32>, vector<8x128xf32> -> vector<8x128xf32>
    %58 = arith.addf %56, %57 : vector<8x128xf32>
    %59 = arith.negf %58 : vector<8x128xf32>
    %60 = math.exp %59 : vector<8x128xf32>
    %cst_13 = arith.constant 1.000000e+00 : f32
    %61 = vector.broadcast %cst_13 : f32 to vector<8x128xf32>
    %62 = arith.addf %61, %60 : vector<8x128xf32>
    %63 = arith.divf %61, %62 : vector<8x128xf32>
    %64 = math.tanh %58 : vector<8x128xf32>
    %65 = vector.extract_strided_slice %63 {offsets = [0, 0], sizes = [8, 32], strides = [1, 1]} : vector<8x128xf32> to vector<8x32xf32>
    %66 = vector.extract_strided_slice %64 {offsets = [0, 64], sizes = [8, 32], strides = [1, 1]} : vector<8x128xf32> to vector<8x32xf32>
    %67 = vector.extract_strided_slice %63 {offsets = [0, 96], sizes = [8, 32], strides = [1, 1]} : vector<8x128xf32> to vector<8x32xf32>
    %68 = vector.extract_strided_slice %63 {offsets = [0, 32], sizes = [8, 32], strides = [1, 1]} : vector<8x128xf32> to vector<8x32xf32>
    %69 = arith.mulf %68, %53 : vector<8x32xf32>
    %70 = arith.mulf %65, %66 : vector<8x32xf32>
    %71 = arith.addf %69, %70 : vector<8x32xf32>
    %72 = math.tanh %71 : vector<8x32xf32>
    %73 = arith.mulf %67, %72 : vector<8x32xf32>
    %74 = vector.extract_strided_slice %5 {offsets = [32, 0], sizes = [8, 128], strides = [1, 1]} : vector<64x256xf32> to vector<8x128xf32>
    %cst_14 = arith.constant dense<0.000000e+00> : vector<8x128xf32>
    %75 = tpu.matmul %73, %6, %cst_14 {dimension_numbers = #tpu.dot_dimension_numbers<[1], [0], [0], [1], [0, 0, 1, 1], [], []>} : vector<8x32xf32>, vector<32x128xf32>, vector<8x128xf32> -> vector<8x128xf32>
    %76 = arith.addf %74, %75 : vector<8x128xf32>
    %77 = arith.negf %76 : vector<8x128xf32>
    %78 = math.exp %77 : vector<8x128xf32>
    %cst_15 = arith.constant 1.000000e+00 : f32
    %79 = vector.broadcast %cst_15 : f32 to vector<8x128xf32>
    %80 = arith.addf %79, %78 : vector<8x128xf32>
    %81 = arith.divf %79, %80 : vector<8x128xf32>
    %82 = math.tanh %76 : vector<8x128xf32>
    %83 = vector.extract_strided_slice %81 {offsets = [0, 0], sizes = [8, 32], strides = [1, 1]} : vector<8x128xf32> to vector<8x32xf32>
    %84 = vector.extract_strided_slice %82 {offsets = [0, 64], sizes = [8, 32], strides = [1, 1]} : vector<8x128xf32> to vector<8x32xf32>
    %85 = vector.extract_strided_slice %81 {offsets = [0, 96], sizes = [8, 32], strides = [1, 1]} : vector<8x128xf32> to vector<8x32xf32>
    %86 = vector.extract_strided_slice %81 {offsets = [0, 32], sizes = [8, 32], strides = [1, 1]} : vector<8x128xf32> to vector<8x32xf32>
    %87 = arith.mulf %86, %71 : vector<8x32xf32>
    %88 = arith.mulf %83, %84 : vector<8x32xf32>
    %89 = arith.addf %87, %88 : vector<8x32xf32>
    %90 = math.tanh %89 : vector<8x32xf32>
    %91 = arith.mulf %85, %90 : vector<8x32xf32>
    %92 = vector.extract_strided_slice %5 {offsets = [40, 0], sizes = [8, 128], strides = [1, 1]} : vector<64x256xf32> to vector<8x128xf32>
    %cst_16 = arith.constant dense<0.000000e+00> : vector<8x128xf32>
    %93 = tpu.matmul %91, %6, %cst_16 {dimension_numbers = #tpu.dot_dimension_numbers<[1], [0], [0], [1], [0, 0, 1, 1], [], []>} : vector<8x32xf32>, vector<32x128xf32>, vector<8x128xf32> -> vector<8x128xf32>
    %94 = arith.addf %92, %93 : vector<8x128xf32>
    %95 = arith.negf %94 : vector<8x128xf32>
    %96 = math.exp %95 : vector<8x128xf32>
    %cst_17 = arith.constant 1.000000e+00 : f32
    %97 = vector.broadcast %cst_17 : f32 to vector<8x128xf32>
    %98 = arith.addf %97, %96 : vector<8x128xf32>
    %99 = arith.divf %97, %98 : vector<8x128xf32>
    %100 = math.tanh %94 : vector<8x128xf32>
    %101 = vector.extract_strided_slice %99 {offsets = [0, 0], sizes = [8, 32], strides = [1, 1]} : vector<8x128xf32> to vector<8x32xf32>
    %102 = vector.extract_strided_slice %100 {offsets = [0, 64], sizes = [8, 32], strides = [1, 1]} : vector<8x128xf32> to vector<8x32xf32>
    %103 = vector.extract_strided_slice %99 {offsets = [0, 96], sizes = [8, 32], strides = [1, 1]} : vector<8x128xf32> to vector<8x32xf32>
    %104 = vector.extract_strided_slice %99 {offsets = [0, 32], sizes = [8, 32], strides = [1, 1]} : vector<8x128xf32> to vector<8x32xf32>
    %105 = arith.mulf %104, %89 : vector<8x32xf32>
    %106 = arith.mulf %101, %102 : vector<8x32xf32>
    %107 = arith.addf %105, %106 : vector<8x32xf32>
    %108 = math.tanh %107 : vector<8x32xf32>
    %109 = arith.mulf %103, %108 : vector<8x32xf32>
    %110 = vector.extract_strided_slice %5 {offsets = [48, 0], sizes = [8, 128], strides = [1, 1]} : vector<64x256xf32> to vector<8x128xf32>
    %cst_18 = arith.constant dense<0.000000e+00> : vector<8x128xf32>
    %111 = tpu.matmul %109, %6, %cst_18 {dimension_numbers = #tpu.dot_dimension_numbers<[1], [0], [0], [1], [0, 0, 1, 1], [], []>} : vector<8x32xf32>, vector<32x128xf32>, vector<8x128xf32> -> vector<8x128xf32>
    %112 = arith.addf %110, %111 : vector<8x128xf32>
    %113 = arith.negf %112 : vector<8x128xf32>
    %114 = math.exp %113 : vector<8x128xf32>
    %cst_19 = arith.constant 1.000000e+00 : f32
    %115 = vector.broadcast %cst_19 : f32 to vector<8x128xf32>
    %116 = arith.addf %115, %114 : vector<8x128xf32>
    %117 = arith.divf %115, %116 : vector<8x128xf32>
    %118 = math.tanh %112 : vector<8x128xf32>
    %119 = vector.extract_strided_slice %117 {offsets = [0, 0], sizes = [8, 32], strides = [1, 1]} : vector<8x128xf32> to vector<8x32xf32>
    %120 = vector.extract_strided_slice %118 {offsets = [0, 64], sizes = [8, 32], strides = [1, 1]} : vector<8x128xf32> to vector<8x32xf32>
    %121 = vector.extract_strided_slice %117 {offsets = [0, 96], sizes = [8, 32], strides = [1, 1]} : vector<8x128xf32> to vector<8x32xf32>
    %122 = vector.extract_strided_slice %117 {offsets = [0, 32], sizes = [8, 32], strides = [1, 1]} : vector<8x128xf32> to vector<8x32xf32>
    %123 = arith.mulf %122, %107 : vector<8x32xf32>
    %124 = arith.mulf %119, %120 : vector<8x32xf32>
    %125 = arith.addf %123, %124 : vector<8x32xf32>
    %126 = math.tanh %125 : vector<8x32xf32>
    %127 = arith.mulf %121, %126 : vector<8x32xf32>
    %128 = vector.extract_strided_slice %5 {offsets = [56, 0], sizes = [8, 128], strides = [1, 1]} : vector<64x256xf32> to vector<8x128xf32>
    %cst_20 = arith.constant dense<0.000000e+00> : vector<8x128xf32>
    %129 = tpu.matmul %127, %6, %cst_20 {dimension_numbers = #tpu.dot_dimension_numbers<[1], [0], [0], [1], [0, 0, 1, 1], [], []>} : vector<8x32xf32>, vector<32x128xf32>, vector<8x128xf32> -> vector<8x128xf32>
    %130 = arith.addf %128, %129 : vector<8x128xf32>
    %131 = arith.negf %130 : vector<8x128xf32>
    %132 = math.exp %131 : vector<8x128xf32>
    %cst_21 = arith.constant 1.000000e+00 : f32
    %133 = vector.broadcast %cst_21 : f32 to vector<8x128xf32>
    %134 = arith.addf %133, %132 : vector<8x128xf32>
    %135 = arith.divf %133, %134 : vector<8x128xf32>
    %136 = math.tanh %130 : vector<8x128xf32>
    %137 = vector.extract_strided_slice %135 {offsets = [0, 0], sizes = [8, 32], strides = [1, 1]} : vector<8x128xf32> to vector<8x32xf32>
    %138 = vector.extract_strided_slice %136 {offsets = [0, 64], sizes = [8, 32], strides = [1, 1]} : vector<8x128xf32> to vector<8x32xf32>
    %139 = vector.extract_strided_slice %135 {offsets = [0, 96], sizes = [8, 32], strides = [1, 1]} : vector<8x128xf32> to vector<8x32xf32>
    %140 = vector.extract_strided_slice %135 {offsets = [0, 32], sizes = [8, 32], strides = [1, 1]} : vector<8x128xf32> to vector<8x32xf32>
    %141 = arith.mulf %140, %125 : vector<8x32xf32>
    %142 = arith.mulf %137, %138 : vector<8x32xf32>
    %143 = arith.addf %141, %142 : vector<8x32xf32>
    %144 = math.tanh %143 : vector<8x32xf32>
    %145 = arith.mulf %139, %144 : vector<8x32xf32>
    %146 = vector.extract_strided_slice %5 {offsets = [56, 128], sizes = [8, 128], strides = [1, 1]} : vector<64x256xf32> to vector<8x128xf32>
    %147 = arith.negf %146 : vector<8x128xf32>
    %148 = math.exp %147 : vector<8x128xf32>
    %cst_22 = arith.constant 1.000000e+00 : f32
    %149 = vector.broadcast %cst_22 : f32 to vector<8x128xf32>
    %150 = arith.addf %149, %148 : vector<8x128xf32>
    %151 = arith.divf %149, %150 : vector<8x128xf32>
    %152 = math.tanh %146 : vector<8x128xf32>
    %153 = vector.extract_strided_slice %151 {offsets = [0, 0], sizes = [8, 32], strides = [1, 1]} : vector<8x128xf32> to vector<8x32xf32>
    %154 = vector.extract_strided_slice %152 {offsets = [0, 64], sizes = [8, 32], strides = [1, 1]} : vector<8x128xf32> to vector<8x32xf32>
    %155 = vector.extract_strided_slice %151 {offsets = [0, 96], sizes = [8, 32], strides = [1, 1]} : vector<8x128xf32> to vector<8x32xf32>
    %156 = arith.mulf %153, %154 : vector<8x32xf32>
    %157 = math.tanh %156 : vector<8x32xf32>
    %158 = arith.mulf %155, %157 : vector<8x32xf32>
    %c0_23 = arith.constant 0 : index
    %c0_24 = arith.constant 0 : index
    %159 = vector.load %arg4[%c0_23, %c0_24] : memref<32x384xf32, #tpu.memory_space<vmem>>, vector<32x384xf32>
    %cst_25 = arith.constant dense<0.000000e+00> : vector<8x384xf32>
    %160 = tpu.matmul %145, %159, %cst_25 {dimension_numbers = #tpu.dot_dimension_numbers<[1], [0], [0], [1], [0, 0, 1, 1], [], []>} : vector<8x32xf32>, vector<32x384xf32>, vector<8x384xf32> -> vector<8x384xf32>
    %c0_26 = arith.constant 0 : index
    %c0_27 = arith.constant 0 : index
    %161 = vector.load %arg5[%c0_26, %c0_27] : memref<32x384xf32, #tpu.memory_space<vmem>>, vector<32x384xf32>
    %cst_28 = arith.constant dense<0.000000e+00> : vector<8x384xf32>
    %162 = tpu.matmul %158, %161, %cst_28 {dimension_numbers = #tpu.dot_dimension_numbers<[1], [0], [0], [1], [0, 0, 1, 1], [], []>} : vector<8x32xf32>, vector<32x384xf32>, vector<8x384xf32> -> vector<8x384xf32>
    %163 = arith.addf %160, %162 : vector<8x384xf32>
    %c0_29 = arith.constant 0 : index
    %c0_30 = arith.constant 0 : index
    %164 = vector.load %arg6[%c0_29, %c0_30] : memref<1x384xf32, #tpu.memory_space<vmem>>, vector<1x384xf32>
    %165 = vector.broadcast %164 : vector<1x384xf32> to vector<8x384xf32>
    %166 = arith.addf %163, %165 : vector<8x384xf32>
    %167 = vector.extract_strided_slice %166 {offsets = [0, 0], sizes = [8, 128], strides = [1, 1]} : vector<8x384xf32> to vector<8x128xf32>
    %c0_31 = arith.constant 0 : index
    %c0_32 = arith.constant 0 : index
    %c0_33 = arith.constant 0 : index
    %168 = vector.load %arg7[%c0_31, %c0_32, %c0_33] : memref<3x128x128xf32, #tpu.memory_space<vmem>>, vector<1x128x128xf32>
    %169 = vector.shape_cast %168 : vector<1x128x128xf32> to vector<128x128xf32>
    %cst_34 = arith.constant dense<0.000000e+00> : vector<8x128xf32>
    %170 = tpu.matmul %167, %169, %cst_34 {dimension_numbers = #tpu.dot_dimension_numbers<[1], [0], [0], [1], [0, 0, 1, 1], [], []>} : vector<8x128xf32>, vector<128x128xf32>, vector<8x128xf32> -> vector<8x128xf32>
    %c0_35 = arith.constant 0 : index
    %c0_36 = arith.constant 0 : index
    %171 = vector.load %arg8[%c0_35, %c0_36] : memref<1x384xf32, #tpu.memory_space<vmem>>, vector<1x128xf32>
    %172 = vector.broadcast %171 : vector<1x128xf32> to vector<8x128xf32>
    %173 = arith.addf %170, %172 : vector<8x128xf32>
    %c0_37 = arith.constant 0 : index
    %c0_38 = arith.constant 0 : index
    %174 = vector.load %arg9[%c0_37, %c0_38] : memref<8x384xf32, #tpu.memory_space<vmem>>, vector<8x128xf32>
    tpu.vector_store %arg9[%c0_37, %c0_38], %173 {strides = array<i32>} : memref<8x384xf32, #tpu.memory_space<vmem>>, vector<8x128xf32>,
    %175 = vector.extract_strided_slice %166 {offsets = [0, 128], sizes = [8, 128], strides = [1, 1]} : vector<8x384xf32> to vector<8x128xf32>
    %c1 = arith.constant 1 : index
    %c0_39 = arith.constant 0 : index
    %c0_40 = arith.constant 0 : index
    %176 = vector.load %arg7[%c1, %c0_39, %c0_40] : memref<3x128x128xf32, #tpu.memory_space<vmem>>, vector<1x128x128xf32>
    %177 = vector.shape_cast %176 : vector<1x128x128xf32> to vector<128x128xf32>
    %cst_41 = arith.constant dense<0.000000e+00> : vector<8x128xf32>
    %178 = tpu.matmul %175, %177, %cst_41 {dimension_numbers = #tpu.dot_dimension_numbers<[1], [0], [0], [1], [0, 0, 1, 1], [], []>} : vector<8x128xf32>, vector<128x128xf32>, vector<8x128xf32> -> vector<8x128xf32>
    %c0_42 = arith.constant 0 : index
    %c128 = arith.constant 128 : index
    %179 = vector.load %arg8[%c0_42, %c128] : memref<1x384xf32, #tpu.memory_space<vmem>>, vector<1x128xf32>
    %180 = vector.broadcast %179 : vector<1x128xf32> to vector<8x128xf32>
    %181 = arith.addf %178, %180 : vector<8x128xf32>
    %c0_43 = arith.constant 0 : index
    %c128_44 = arith.constant 128 : index
    %182 = vector.load %arg9[%c0_43, %c128_44] : memref<8x384xf32, #tpu.memory_space<vmem>>, vector<8x128xf32>
    tpu.vector_store %arg9[%c0_43, %c128_44], %181 {strides = array<i32>} : memref<8x384xf32, #tpu.memory_space<vmem>>, vector<8x128xf32>,
    %183 = vector.extract_strided_slice %166 {offsets = [0, 256], sizes = [8, 128], strides = [1, 1]} : vector<8x384xf32> to vector<8x128xf32>
    %c2 = arith.constant 2 : index
    %c0_45 = arith.constant 0 : index
    %c0_46 = arith.constant 0 : index
    %184 = vector.load %arg7[%c2, %c0_45, %c0_46] : memref<3x128x128xf32, #tpu.memory_space<vmem>>, vector<1x128x128xf32>
    %185 = vector.shape_cast %184 : vector<1x128x128xf32> to vector<128x128xf32>
    %cst_47 = arith.constant dense<0.000000e+00> : vector<8x128xf32>
    %186 = tpu.matmul %183, %185, %cst_47 {dimension_numbers = #tpu.dot_dimension_numbers<[1], [0], [0], [1], [0, 0, 1, 1], [], []>} : vector<8x128xf32>, vector<128x128xf32>, vector<8x128xf32> -> vector<8x128xf32>
    %c0_48 = arith.constant 0 : index
    %c256 = arith.constant 256 : index
    %187 = vector.load %arg8[%c0_48, %c256] : memref<1x384xf32, #tpu.memory_space<vmem>>, vector<1x128xf32>
    %188 = vector.broadcast %187 : vector<1x128xf32> to vector<8x128xf32>
    %189 = arith.addf %186, %188 : vector<8x128xf32>
    %c0_49 = arith.constant 0 : index
    %c256_50 = arith.constant 256 : index
    %190 = vector.load %arg9[%c0_49, %c256_50] : memref<8x384xf32, #tpu.memory_space<vmem>>, vector<8x128xf32>
    tpu.vector_store %arg9[%c0_49, %c256_50], %189 {strides = array<i32>} : memref<8x384xf32, #tpu.memory_space<vmem>>, vector<8x128xf32>,
    return
  }
}

</mosaic_0001>

<bundles_post_ra>
// kernel: net_forward.1
= control target key start
LH: loop header
LB: loop body
LE: loop exit
PB: predicated region body
PF: predicated region fallthrough
CT: control target
= control target key end

     0   :  { %14 = vsyncpa [#allocation3], 0  ;;  %s2688_s0 = inlined_call_operand.vmem [shape: f32[64,16], index: 0, kind: input, shape index: {}]   ;;  %s2689_s1 = inlined_call_operand.vmem [shape: f32[16,256], index: 1, kind: input, shape index: {}]   ;;  %s2690_s2 = inlined_call_operand.hbm [shape: f32[1,256], index: 2, kind: input, shape index: {}]   ;;  %s2691_s3 = inlined_call_operand.hbm [shape: f32[32,128], index: 3, kind: input, shape index: {}]   ;;  %s2692_s4 = inlined_call_operand.vmem [shape: f32[32,384], index: 4, kind: input, shape index: {}]   ;;  %s2693_s5 = inlined_call_operand.hbm [shape: f32[32,384], index: 5, kind: input, shape index: {}]   ;;  %s2694_s6 = inlined_call_operand.vmem [shape: f32[1,384], index: 6, kind: input, shape index: {}]   ;;  %s2695_s7 = inlined_call_operand.hbm [shape: f32[3,128,128], index: 7, kind: input, shape index: {}]   ;;  %s2696_s8 = inlined_call_operand.vmem [shape: f32[1,384], index: 8, kind: input, shape index: {}]   ;;  %s2697_s9 = inlined_call_operand.vmem [shape: f32[8,384], index: 9, kind: output, shape index: {}]  }
   0x1   :  { %15 = vsyncpa [#allocation5], 0 }
   0x2   :  { %16 = vsyncpa [#allocation8], 0  ;;  %s2289_s30 = smov [#allocation4]   ;;  %s2195_s13 = scalar_lea.hbm %s2691_s3, 512 }
   0x3   :  { %s36_s10 = sshll.u32 %s2289_s30, 4  ;;  %p2196_p0 = scmp.ne.s32.totalorder %s2691_s3, %s2195_s13  ;;  %s37_s10 = int_to_ptr.vmem [resolvable:$true] %s36_s10 }
   0x4   :  { %p2199_p1 = scmp.lt.u32.totalorder %s2195_s13, %s2691_s3 }
   0x6   :  { %p2201_p2 = pnand %p2199_p1, %p2196_p0 }
   0x8   :  { %2204 = shalt.err (!%p2201_p2)
}
   0x9   :  { %s2205_s18 = scalar_lea.vmem %s37_s10, 512  ;;  %p2210_p4 = scmp.lt.s32.totalorder %s37_s10, %s37_s10 }
   0xa   :  { %p2206_p3 = scmp.ne.s32.totalorder %s37_s10, %s2205_s18  ;;  %p2211_p5 = scmp.lt.s32.totalorder %s2205_s18, %s2205_s18 }
   0xc   :  { %p2212_p6 = por %p2211_p5, %p2210_p4 }
   0xe   :  { %p2213_p7 = pnand %p2212_p6, %p2206_p3 }
  0x10   :  { %2216 = shalt.err (!%p2213_p7)
}
  0x11   :  { %s2290_s19 = smov 128   ;;  %s2291_s20 = smov 8  }
  0x12   :  { %42 = dma.hbm_to_vmem [thread:$0]  %s2691_s3, 512, %s37_s10, [#allocation5], %s2290_s19, %s2290_s19, %s2291_s20  }
  0x13   :  { %s2292_s23 = smov [#allocation2]   ;;  %s2293_s25 = smov [#allocation6]  }
  0x14   :  { %s27_s24 = sshll.u32 %s2292_s23, 4  ;;  %s50_s26 = sshll.u32 %s2293_s25, 4  ;;  %s28_s24 = int_to_ptr.vmem [resolvable:$true] %s27_s24  ;;  %s51_s26 = int_to_ptr.vmem [resolvable:$true] %s50_s26 }
  0x15   :  { %s2217_s29 = scalar_lea.hbm %s2690_s2, 32 }
  0x16   :  { %p2218_p8 = scmp.ne.s32.totalorder %s2690_s2, %s2217_s29  ;;  %p2221_p9 = scmp.lt.u32.totalorder %s2217_s29, %s2690_s2 }
  0x18   :  { %p2223_p10 = pnand %p2221_p9, %p2218_p8 }
  0x1a   :  { %2226 = shalt.err (!%p2223_p10)
}
  0x1b   :  { %s2227_s3 = scalar_lea.vmem %s28_s24, 32  ;;  %p2232_p12 = scmp.lt.s32.totalorder %s28_s24, %s28_s24 }
  0x1c   :  { %p2228_p11 = scmp.ne.s32.totalorder %s28_s24, %s2227_s3  ;;  %p2233_p13 = scmp.lt.s32.totalorder %s2227_s3, %s2227_s3 }
  0x1e   :  { %p2234_p0 = por %p2233_p13, %p2232_p12 }
  0x20   :  { %p2235_p1 = pnand %p2234_p0, %p2228_p11 }
  0x22   :  { %2238 = shalt.err (!%p2235_p1)
}
  0x23   :  { %30 = dma.hbm_to_vmem [thread:$0]  %s2690_s2, 32, %s28_s24, [#allocation3]  }
  0x24   :  { %s2239_s17 = scalar_lea.hbm %s2693_s5, 1536 }
  0x25   :  { %p2240_p2 = scmp.ne.s32.totalorder %s2693_s5, %s2239_s17  ;;  %p2243_p3 = scmp.lt.u32.totalorder %s2239_s17, %s2693_s5 }
  0x27   :  { %p2245_p4 = pnand %p2243_p3, %p2240_p2 }
  0x29   :  { %2248 = shalt.err (!%p2245_p4)
}
  0x2a   :  { %s2249_s25 = scalar_lea.vmem %s51_s26, 1536  ;;  %p2254_p6 = scmp.lt.s32.totalorder %s51_s26, %s51_s26 }
  0x2b   :  { %p2250_p5 = scmp.ne.s32.totalorder %s51_s26, %s2249_s25  ;;  %p2255_p7 = scmp.lt.s32.totalorder %s2249_s25, %s2249_s25 }
  0x2d   :  { %p2256_p8 = por %p2255_p7, %p2254_p6 }
  0x2f   :  { %p2257_p9 = pnand %p2256_p8, %p2250_p5 }
  0x31   :  { %2260 = shalt.err (!%p2257_p9)
}
  0x32   :  { %s2294_s2 = smov 384   ;;  %s2295_s24 = smov 24  }
  0x33   :  { %56 = dma.hbm_to_vmem [thread:$0]  %s2693_s5, 1536, %s51_s26, [#allocation5], %s2294_s2, %s2294_s2, %s2295_s24  }
  0x34   :  { %s2296_s29 = smov [#allocation7]   ;;  %s2261_s13 = scalar_lea.hbm %s2695_s7, 6144 }
  0x35   :  { %s64_s30 = sshll.u32 %s2296_s29, 4  ;;  %p2262_p10 = scmp.ne.s32.totalorder %s2695_s7, %s2261_s13  ;;  %s65_s30 = int_to_ptr.vmem [resolvable:$true] %s64_s30 }
  0x36   :  { %p2265_p11 = scmp.lt.u32.totalorder %s2261_s13, %s2695_s7 }
  0x38   :  { %p2267_p12 = pnand %p2265_p11, %p2262_p10 }
  0x3a   :  { %2270 = shalt.err (!%p2267_p12)
}
  0x3b   :  { %s2271_s16 = scalar_lea.vmem %s65_s30, 6144  ;;  %p2276_p0 = scmp.lt.s32.totalorder %s65_s30, %s65_s30 }
  0x3c   :  { %p2272_p13 = scmp.ne.s32.totalorder %s65_s30, %s2271_s16  ;;  %p2277_p1 = scmp.lt.s32.totalorder %s2271_s16, %s2271_s16 }
  0x3e   :  { %p2278_p2 = por %p2277_p1, %p2276_p0 }
  0x40   :  { %p2279_p3 = pnand %p2278_p2, %p2272_p13 }
  0x42   :  { %2282 = shalt.err (!%p2279_p3)
}
  0x43   :  { %70 = dma.hbm_to_vmem [thread:$0]  %s2695_s7, 6144, %s65_s30, [#allocation8], %s2290_s19, %s2290_s19, %s2291_s20  }
  0x44   :  { %2283 = dma.done.wait [#allocation3], 32  }
  0x45   :  { %2284 = vsyncadd [#allocation3], 4294967264 }
  0x46   :  { %2285 = dma.done.wait [#allocation5], 2048  }
  0x47   :  { %2286 = vsyncadd [#allocation5], 4294965248 }
  0x48   :  { %2287 = dma.done.wait [#allocation8], 6144  }
  0x49   :  { %2288 = vsyncadd [#allocation8], 4294961152  ;;  %v2297_v0 = vmov 0.0   ;;  %v94_v1 = vld [vmem:[%s2689_s1 + $0x8] sm:$0xff]  ;;  %v96_v2 = vld [vmem:[%s2689_s1 + $0x18] sm:$0xff]  ;;  %vm109_vm0 = vcmask 130048   ;;  %v99_v8 = vlaneseq }
  0x4a   :  { %198 = vmatprep.mubr.f32.mxu0 %v2297_v0  ;;  %v93_v3 = vld [vmem:[%s2689_s1] sm:$0xff]  ;;  %v1943_v4 = vpack.c.bf16 %v96_v2, %v94_v1  ;;  %v95_v5 = vld [vmem:[%s2689_s1 + $0x10] sm:$0xff]  ;;  %s2298_s1 = smov 64   ;;  %v86_v25 = vld [vmem:[%s2688_s0 + $0x8] sm:$0xff]  ;;  %v2299_v26 = vmov 0.0|0.0   ;;  %vm2300_vm1 = vmmov 0  }
  0x4b   :  { %v1945_v6 = vpack.c.bf16 %v95_v5, %v93_v3  ;;  %v85_v7 = vld [vmem:[%s2688_s0] sm:$0xff]  ;;  %v2425_v9 = vshrl.u32 %v99_v8, 7  ;;  %v241_v24 = vld [vmem:[#allocation4 + $0x8] sm:$0xff]  ;;  %v242_v29 = vld [vmem:[#allocation4 + $0x10] sm:$0xff]  ;;  %1983 = vmatprep.subr.bf16.mxu1 %v2299_v26  ;;  %1813 = vmatprep.mubr.msk.f32.mxu1 %vm2300_vm1, %v2297_v0  ;;  %s2301_s12 = smov 96   ;;  %s2302_s10 = smov 32  }
  0x4c   :  { %1944 = vmatprep.subr.bf16.mxu0 %v1943_v4  ;;  %v2428_v11 = vld [vmem:[#allocation2] sm:$0x3]  ;;  %v240_v23 = vld [vmem:[#allocation4] sm:$0xff]  ;;  %v87_v28 = vld [vmem:[%s2688_s0 + $0x10] sm:$0xff]  ;;  %vm265_vm2 = vcmask 261120  }
  0x4d   :  { %1946 = vmatpush1.bf16.msra.mxu0 %v1945_v6  ;;  %v101_v10 = vsub.s32 0, %v2425_v9  ;;  %v2441_v27 = vpack.c.bf16 %v241_v24, %v240_v23  ;;  %v243_v30 = vld [vmem:[#allocation4 + $0x18] sm:$0xff]  ;;  %v90_v35 = vld [vmem:[%s2688_s0 + $0x28] sm:$0xff]  ;;  %v91_v36 = vld [vmem:[%s2688_s0 + $0x30] sm:$0xff] }
  0x4e   :  { %1947 = vmatprep.subr.bf16.mxu0 %v2299_v26  ;;  %v2450_v31 = vpack.c.bf16 %v243_v30, %v242_v29  ;;  %v88_v32 = vld [vmem:[%s2688_s0 + $0x18] sm:$0xff]  ;;  %v89_v34 = vld [vmem:[%s2688_s0 + $0x20] sm:$0xff] }
  0x4f   :  { %v2433_v12 = vrot.slane %v2428_v11, %v101_v10  ;;  %1985 = vmatpush3.bf16.msra.mxu1 %v2441_v27  ;;  %v92_v37 = vld [vmem:[%s2688_s0 + $0x38] sm:$0xff] }
  0x50   :  { %1612 = vmatmul.mubr.msk.f32.vlgmr.msra.gmra.mrb[0].mxu0 %vm109_vm0, %v85_v7  ;;  %1986 = vmatprep.subr.bf16.mxu1 %v2299_v26 }
  0x51   :  { %203 = vmatprep.mubr.f32.mxu0 %v2297_v0  ;;  %1949 = vmatpush3.bf16.msra.mxu0 %v2441_v27 }
  0x52   :  { %1950 = vmatprep.subr.bf16.mxu0 %v2299_v26 }
  0x53   :  { %1988 = vmatpush3.bf16.msra.mxu1 %v2450_v31 }
  0x54   :  { %1613 = vmatmul.mubr.msk.f32.gmra.mrb[2].mxu0 %vm109_vm0, %v86_v25 }
  0x55   :  { %208 = vmatprep.mubr.f32.mxu0 %v2297_v0  ;;  %1952 = vmatpush3.bf16.msra.mxu0 %v2450_v31 }
  0x56   :  { %1953 = vmatprep.subr.bf16.mxu0 %v2299_v26 }
  0x58   :  { %1614 = vmatmul.mubr.msk.f32.gmra.mrb[4].mxu0 %vm109_vm0, %v87_v28 }
  0x59   :  { %213 = vmatprep.mubr.f32.mxu0 %v2297_v0 }
  0x5c   :  { %1615 = vmatmul.mubr.msk.f32.gmra.mrb[6].mxu0 %vm109_vm0, %v88_v32 }
  0x5d   :  { %218 = vmatprep.mubr.f32.mxu0 %v2297_v0 }
  0x60   :  { %1616 = vmatmul.mubr.msk.f32.gmra.mrb[8].mxu0 %vm109_vm0, %v89_v34 }
  0x61   :  { %223 = vmatprep.mubr.f32.mxu0 %v2297_v0 }
  0x64   :  { %1617 = vmatmul.mubr.msk.f32.gmra.mrb[10].mxu0 %vm109_vm0, %v90_v35 }
  0x65   :  { %228 = vmatprep.mubr.f32.mxu0 %v2297_v0 }
  0x68   :  { %1618 = vmatmul.mubr.msk.f32.gmra.mrb[12].mxu0 %vm109_vm0, %v91_v36 }
  0x69   :  { %233 = vmatprep.mubr.f32.mxu0 %v2297_v0 }
  0x6c   :  { %1619 = vmatmul.mubr.msk.f32.gmra.mrb[14].mxu0 %vm109_vm0, %v92_v37 }
  0x6d   :  { %1747 = vmatprep.mubr.msk.f32.mxu0 %vm2300_vm1, %v2297_v0 }
 0x123   :  { %v200_v13 = vpop.f32.mrb[0].mxu0 }
 0x124   :  { %v201_v14 = vadd.f32 %v200_v13, %v2433_v12  ;;  %v202_v15 = vpop.f32.mrb[1].mxu0 }
 0x126   :  { %2123 = vtanh.f32 %v201_v14  ;;  %v1620_v17 = vmul.f32 -1.442695, %v201_v14 }
 0x128   :  { %2125 = vpow2.f32 %v1620_v17 }
 0x130   :  { %v2124_v16 = vpop.eup %2123 }
 0x131   :  { %252 = vrot.lane.b32.xlu0 %v2124_v16, %s2298_s1 }
 0x132   :  { %v2126_v18 = vpop.eup %2125 }
 0x133   :  { %v247_v19 = vadd.f32 1.0, %v2126_v18 }
 0x135   :  { %2127 = vrcp.f32 %v247_v19 }
 0x13f   :  { %v2128_v20 = vpop.eup %2127  ;;  %v2491_v40 = vpop.f32.mrb[14].mxu0 }
 0x140   :  { %v2493_v41 = vpop.f32.mrb[15].mxu0 }
 0x1a3   :  { %v253_v21 = vpop.permute.xlu0 %252 }
 0x1a4   :  { %v255_v22 = vmul.f32 %v2128_v20, %v253_v21 }
 0x1a6   :  { %2129 = vtanh.f32 %v255_v22 }
 0x1b0   :  { %v2130_v33 = vpop.eup %2129 }
 0x1b1   :  { %258 = vrot.lane.b32.xlu0 %v2130_v33, %s2301_s12 }
 0x1b5   :  { %347 = vrot.lane.b32.xlu0 %v255_v22, %s2302_s10 }
 0x223   :  { %v259_v38 = vpop.permute.xlu0 %258 }
 0x224   :  { %v261_v39 = vmul.f32 %v2128_v20, %v259_v38 }
 0x226   :  { %263 = vrot.lane.b32.xlu1 %v261_v39, %s2302_s10 }
 0x227   :  { %v348_v53 = vpop.permute.xlu0 %347 }
 0x298   :  { %v264_v42 = vpop.permute.xlu1 %263 }
 0x299   :  { %1748 = vmatmul.mubr.msk.f32.vlgmr.msra.gmra.mrb[2].mxu0 %vm265_vm2, %v264_v42 }
 0x29a   :  { %1955 = vmatpush3.bf16.msra.mxu0 %v2441_v27  ;;  %1758 = vmatprep.mubr.msk.f32.mxu0 %vm2300_vm1, %v2297_v0 }
 0x29b   :  { %1956 = vmatprep.subr.bf16.mxu0 %v2299_v26 }
 0x29e   :  { %1958 = vmatpush3.bf16.msra.mxu0 %v2450_v31 }
 0x29f   :  { %1959 = vmatprep.subr.bf16.mxu0 %v2299_v26 }
 0x36c   :  { %v334_v43 = vpop.f32.mrb[2].mxu0 }
 0x36d   :  { %v2089_v44 = vadd.f32 %v334_v43, %v2433_v12  ;;  %v1749_v45 = vpop.f32.mrb[3].mxu0 }
 0x36f   :  { %2131 = vtanh.f32 %v2089_v44  ;;  %v1622_v47 = vmul.f32 -1.442695, %v2089_v44 }
 0x371   :  { %2133 = vpow2.f32 %v1622_v47 }
 0x379   :  { %v2132_v46 = vpop.eup %2131 }
 0x37a   :  { %352 = vrot.lane.b32.xlu1 %v2132_v46, %s2298_s1 }
 0x37b   :  { %v2134_v48 = vpop.eup %2133 }
 0x37c   :  { %v342_v49 = vadd.f32 1.0, %v2134_v48 }
 0x37e   :  { %2135 = vrcp.f32 %v342_v49 }
 0x388   :  { %v2136_v50 = vpop.eup %2135 }
 0x389   :  { %v350_v54 = vmul.f32 %v2136_v50, %v348_v53 }
 0x3ec   :  { %v353_v51 = vpop.permute.xlu1 %352 }
 0x3ed   :  { %v355_v52 = vmul.f32 %v2136_v50, %v353_v51 }
 0x3ef   :  { %357 = vrot.lane.b32.xlu1 %v355_v52, %s2302_s10 }
 0x461   :  { %v358_v55 = vpop.permute.xlu1 %357 }
 0x462   :  { %v360_v56 = vadd.f32 %v358_v55, %v350_v54 }
 0x464   :  { %2137 = vtanh.f32 %v360_v56 }
 0x46e   :  { %v2138_v57 = vpop.eup %2137 }
 0x46f   :  { %363 = vrot.lane.b32.xlu0 %v2138_v57, %s2298_s1 }
 0x4e1   :  { %v364_v58 = vpop.permute.xlu0 %363 }
 0x4e2   :  { %v366_v59 = vmul.f32 %v2136_v50, %v364_v58 }
 0x4e4   :  { %368 = vrot.lane.b32.xlu1 %v366_v59, %s2302_s10 }
 0x556   :  { %v369_v60 = vpop.permute.xlu1 %368 }
 0x557   :  { %1759 = vmatmul.mubr.msk.f32.vlgmr.msra.gmra.mrb[4].mxu0 %vm265_vm2, %v369_v60 }
 0x558   :  { %1961 = vmatpush3.bf16.msra.mxu0 %v2441_v27  ;;  %1769 = vmatprep.mubr.msk.f32.mxu0 %vm2300_vm1, %v2297_v0 }
 0x559   :  { %1962 = vmatprep.subr.bf16.mxu0 %v2299_v26 }
 0x55c   :  { %1964 = vmatpush3.bf16.msra.mxu0 %v2450_v31 }
 0x55d   :  { %1965 = vmatprep.subr.bf16.mxu0 %v2299_v26 }
 0x62a   :  { %v438_v61 = vpop.f32.mrb[4].mxu0 }
 0x62b   :  { %v2090_v62 = vadd.f32 %v438_v61, %v2433_v12  ;;  %v1760_v63 = vpop.f32.mrb[5].mxu0 }
 0x62d   :  { %2139 = vtanh.f32 %v2090_v62  ;;  %v1624_v2 = vmul.f32 -1.442695, %v2090_v62 }
 0x62f   :  { %2141 = vpow2.f32 %v1624_v2 }
 0x637   :  { %v2140_v1 = vpop.eup %2139 }
 0x638   :  { %452 = vrot.lane.b32.xlu0 %v2140_v1, %s2298_s1 }
 0x639   :  { %v2142_v3 = vpop.eup %2141 }
 0x63a   :  { %v446_v4 = vadd.f32 1.0, %v2142_v3 }
 0x63c   :  { %2143 = vrcp.f32 %v446_v4 }
 0x646   :  { %v2144_v5 = vpop.eup %2143 }
 0x647   :  { %v450_v8 = vmul.f32 %v2144_v5, %v360_v56 }
 0x6aa   :  { %v453_v6 = vpop.permute.xlu0 %452 }
 0x6ab   :  { %v455_v7 = vmul.f32 %v2144_v5, %v453_v6 }
 0x6ad   :  { %457 = vrot.lane.b32.xlu1 %v455_v7, %s2302_s10 }
 0x71f   :  { %v458_v13 = vpop.permute.xlu1 %457 }
 0x720   :  { %v460_v14 = vadd.f32 %v458_v13, %v450_v8 }
 0x722   :  { %2145 = vtanh.f32 %v460_v14 }
 0x72c   :  { %v2146_v15 = vpop.eup %2145 }
 0x72d   :  { %463 = vrot.lane.b32.xlu0 %v2146_v15, %s2298_s1 }
 0x79f   :  { %v464_v16 = vpop.permute.xlu0 %463 }
 0x7a0   :  { %v466_v17 = vmul.f32 %v2144_v5, %v464_v16 }
 0x7a2   :  { %468 = vrot.lane.b32.xlu1 %v466_v17, %s2302_s10 }
 0x814   :  { %v469_v18 = vpop.permute.xlu1 %468 }
 0x815   :  { %1770 = vmatmul.mubr.msk.f32.vlgmr.msra.gmra.mrb[6].mxu0 %vm265_vm2, %v469_v18 }
 0x816   :  { %1967 = vmatpush3.bf16.msra.mxu0 %v2441_v27  ;;  %1780 = vmatprep.mubr.msk.f32.mxu0 %vm2300_vm1, %v2297_v0 }
 0x817   :  { %1968 = vmatprep.subr.bf16.mxu0 %v2299_v26 }
 0x81a   :  { %1970 = vmatpush3.bf16.msra.mxu0 %v2450_v31 }
 0x81b   :  { %1971 = vmatprep.subr.bf16.mxu0 %v2299_v26 }
 0x8e8   :  { %v538_v19 = vpop.f32.mrb[6].mxu0 }
 0x8e9   :  { %v2091_v20 = vadd.f32 %v538_v19, %v2433_v12  ;;  %v1771_v21 = vpop.f32.mrb[7].mxu0 }
 0x8eb   :  { %2147 = vtanh.f32 %v2091_v20  ;;  %v1626_v23 = vmul.f32 -1.442695, %v2091_v20 }
 0x8ed   :  { %2149 = vpow2.f32 %v1626_v23 }
 0x8f5   :  { %v2148_v22 = vpop.eup %2147 }
 0x8f6   :  { %552 = vrot.lane.b32.xlu0 %v2148_v22, %s2298_s1 }
 0x8f7   :  { %v2150_v24 = vpop.eup %2149 }
 0x8f8   :  { %v546_v25 = vadd.f32 1.0, %v2150_v24 }
 0x8fa   :  { %2151 = vrcp.f32 %v546_v25 }
 0x904   :  { %v2152_v28 = vpop.eup %2151 }
 0x905   :  { %v550_v32 = vmul.f32 %v2152_v28, %v460_v14 }
 0x968   :  { %v553_v29 = vpop.permute.xlu0 %552 }
 0x969   :  { %v555_v30 = vmul.f32 %v2152_v28, %v553_v29 }
 0x96b   :  { %557 = vrot.lane.b32.xlu1 %v555_v30, %s2302_s10  ;;  %v105_v30 = vsub.s32 1, %v2425_v9 }
 0x9dd   :  { %v558_v33 = vpop.permute.xlu1 %557 }
 0x9de   :  { %v560_v34 = vadd.f32 %v558_v33, %v550_v32  ;;  %v106_v32 = vrot.slane %v2428_v11, %v105_v30 }
 0x9e0   :  { %2153 = vtanh.f32 %v560_v34  ;;  %v238_v33 = vadd.f32 %v2493_v41, %v106_v32 }
 0x9ea   :  { %v2154_v35 = vpop.eup %2153 }
 0x9eb   :  { %563 = vrot.lane.b32.xlu0 %v2154_v35, %s2298_s1 }
 0xa5d   :  { %v564_v36 = vpop.permute.xlu0 %563 }
 0xa5e   :  { %v566_v37 = vmul.f32 %v2152_v28, %v564_v36 }
 0xa60   :  { %568 = vrot.lane.b32.xlu1 %v566_v37, %s2302_s10  ;;  %v1635_v37 = vmul.f32 -1.442695, %v238_v33 }
 0xad2   :  { %v569_v38 = vpop.permute.xlu1 %568 }
 0xad3   :  { %1781 = vmatmul.mubr.msk.f32.vlgmr.msra.gmra.mrb[8].mxu0 %vm265_vm2, %v569_v38 }
 0xad4   :  { %1973 = vmatpush3.bf16.msra.mxu0 %v2441_v27  ;;  %1791 = vmatprep.mubr.msk.f32.mxu0 %vm2300_vm1, %v2297_v0 }
 0xad5   :  { %1974 = vmatprep.subr.bf16.mxu0 %v2299_v26 }
 0xad8   :  { %1976 = vmatpush3.bf16.msra.mxu0 %v2450_v31 }
 0xad9   :  { %1977 = vmatprep.subr.bf16.mxu0 %v2299_v26 }
 0xba6   :  { %v638_v39 = vpop.f32.mrb[8].mxu0 }
 0xba7   :  { %v2092_v42 = vadd.f32 %v638_v39, %v2433_v12  ;;  %v1782_v43 = vpop.f32.mrb[9].mxu0 }
 0xba9   :  { %2155 = vtanh.f32 %v2092_v42  ;;  %v1628_v45 = vmul.f32 -1.442695, %v2092_v42 }
 0xbab   :  { %2157 = vpow2.f32 %v1628_v45  ;;  %v998_v45 = vld [vmem:[#allocation6 + $0x8] sm:$0xff] }
 0xbb3   :  { %v2156_v44 = vpop.eup %2155 }
 0xbb4   :  { %652 = vrot.lane.b32.xlu0 %v2156_v44, %s2298_s1 }
 0xbb5   :  { %v2158_v46 = vpop.eup %2157 }
 0xbb6   :  { %v646_v47 = vadd.f32 1.0, %v2158_v46  ;;  %v1001_v46 = vld [vmem:[#allocation6 + $0x20] sm:$0xff] }
 0xbb8   :  { %2159 = vrcp.f32 %v646_v47  ;;  %v997_v47 = vld [vmem:[#allocation6] sm:$0xff] }
 0xbc2   :  { %v2160_v48 = vpop.eup %2159 }
 0xbc3   :  { %v650_v51 = vmul.f32 %v2160_v48, %v560_v34 }
 0xc26   :  { %v653_v49 = vpop.permute.xlu0 %652 }
 0xc27   :  { %v655_v50 = vmul.f32 %v2160_v48, %v653_v49  ;;  %v1000_v49 = vld [vmem:[#allocation6 + $0x18] sm:$0xff] }
 0xc29   :  { %657 = vrot.lane.b32.xlu1 %v655_v50, %s2302_s10  ;;  %v1004_v50 = vld [vmem:[#allocation6 + $0x38] sm:$0xff] }
 0xc9b   :  { %v658_v52 = vpop.permute.xlu1 %657 }
 0xc9c   :  { %v660_v53 = vadd.f32 %v658_v52, %v650_v51  ;;  %v1007_v51 = vld [vmem:[#allocation6 + $0x50] sm:$0xff]  ;;  %v1991_v52 = vpack.c.bf16 %v1000_v49, %v997_v47 }
 0xc9d   :  { %v1517_v47 = vld [vmem:[#allocation7 + $0x130] sm:$0xff] }
 0xc9e   :  { %2161 = vtanh.f32 %v660_v53 }
 0xca8   :  { %v2162_v54 = vpop.eup %2161 }
 0xca9   :  { %663 = vrot.lane.b32.xlu0 %v2162_v54, %s2298_s1  ;;  %v1003_v54 = vld [vmem:[#allocation6 + $0x30] sm:$0xff] }
 0xd1b   :  { %v664_v55 = vpop.permute.xlu0 %663 }
 0xd1c   :  { %v666_v56 = vmul.f32 %v2160_v48, %v664_v55  ;;  %v1989_v48 = vpack.c.bf16 %v1001_v46, %v998_v45  ;;  %v1006_v55 = vld [vmem:[#allocation6 + $0x48] sm:$0xff] }
 0xd1d   :  { %v1516_v45 = vld [vmem:[#allocation7 + $0x128] sm:$0xff] }
 0xd1e   :  { %668 = vrot.lane.b32.xlu1 %v666_v56, %s2302_s10  ;;  %1990 = vmatprep.subr.bf16.mxu1 %v1989_v48  ;;  %v1995_v56 = vpack.c.bf16 %v1006_v55, %v1003_v54  ;;  %v1518_v48 = vld [vmem:[#allocation7 + $0x138] sm:$0xff]  ;;  %v990_v54 = vld [vmem:[%s2692_s4 + $0x28] sm:$0xff] }
 0xd1f   :  { %v2075_v49 = vpack.c.bf16 %v1518_v48, %v1517_v47  ;;  %v1420_v47 = vld [vmem:[#allocation7 + $0xa0] sm:$0xff] }
 0xd90   :  { %v669_v57 = vpop.permute.xlu1 %668 }
 0xd91   :  { %1792 = vmatmul.mubr.msk.f32.vlgmr.msra.gmra.mrb[10].mxu0 %vm265_vm2, %v669_v57 }
 0xd92   :  { %1979 = vmatpush3.bf16.msra.mxu0 %v2441_v27  ;;  %1802 = vmatprep.mubr.msk.f32.mxu0 %vm2300_vm1, %v2297_v0 }
 0xd93   :  { %1980 = vmatprep.subr.bf16.mxu0 %v2299_v26 }
 0xd96   :  { %1982 = vmatpush3.bf16.msra.mxu0 %v2450_v31 }
 0xd97   :  { %2065 = vmatprep.subr.bf16.mxu0 %v2299_v26 }
 0xe64   :  { %v738_v58 = vpop.f32.mrb[10].mxu0 }
 0xe65   :  { %v2093_v59 = vadd.f32 %v738_v58, %v2433_v12  ;;  %v1793_v60 = vpop.f32.mrb[11].mxu0 }
 0xe67   :  { %2163 = vtanh.f32 %v2093_v59  ;;  %v1630_v62 = vmul.f32 -1.442695, %v2093_v59  ;;  %v236_v59 = vadd.f32 %v2491_v40, %v2433_v12 }
 0xe69   :  { %2165 = vpow2.f32 %v1630_v62 }
 0xe71   :  { %v2164_v61 = vpop.eup %2163 }
 0xe72   :  { %752 = vrot.lane.b32.xlu0 %v2164_v61, %s2298_s1 }
 0xe73   :  { %v2166_v27 = vpop.eup %2165 }
 0xe74   :  { %v746_v63 = vadd.f32 1.0, %v2166_v27 }
 0xe76   :  { %2167 = vrcp.f32 %v746_v63  ;;  %v999_v63 = vld [vmem:[#allocation6 + $0x10] sm:$0xff] }
 0xe80   :  { %v2168_v1 = vpop.eup %2167 }
 0xe81   :  { %v750_v31 = vmul.f32 %v2168_v1, %v660_v53  ;;  %v1993_v53 = vpack.c.bf16 %v1007_v51, %v1004_v50  ;;  %v1519_v50 = vld [vmem:[#allocation7 + $0x140] sm:$0xff]  ;;  %v1520_v51 = vld [vmem:[#allocation7 + $0x148] sm:$0xff] }
 0xee4   :  { %v753_v2 = vpop.permute.xlu0 %752 }
 0xee5   :  { %v755_v3 = vmul.f32 %v2168_v1, %v753_v2 }
 0xee7   :  { %757 = vrot.lane.b32.xlu1 %v755_v3, %s2302_s10  ;;  %v1005_v3 = vld [vmem:[#allocation6 + $0x40] sm:$0xff] }
 0xf59   :  { %v758_v4 = vpop.permute.xlu1 %757 }
 0xf5a   :  { %v760_v5 = vadd.f32 %v758_v4, %v750_v31  ;;  %v1008_v31 = vld [vmem:[#allocation6 + $0x58] sm:$0xff] }
 0xf5c   :  { %2169 = vtanh.f32 %v760_v5 }
 0xf66   :  { %v2170_v6 = vpop.eup %2169 }
 0xf67   :  { %763 = vrot.lane.b32.xlu0 %v2170_v6, %s2298_s1 }
 0xfd9   :  { %v764_v7 = vpop.permute.xlu0 %763 }
 0xfda   :  { %v766_v8 = vmul.f32 %v2168_v1, %v764_v7  ;;  %v1002_v1 = vld [vmem:[#allocation6 + $0x28] sm:$0xff] }
 0xfdb   :  { %v1998_v2 = vpack.c.bf16 %v1002_v1, %v999_v63  ;;  %v1324_v63 = vld [vmem:[#allocation7 + $0x18] sm:$0xff] }
 0xfdc   :  { %768 = vrot.lane.b32.xlu1 %v766_v8, %s2302_s10 }
0x104e   :  { %v769_v13 = vpop.permute.xlu1 %768 }
0x104f   :  { %1803 = vmatmul.mubr.msk.f32.vlgmr.msra.gmra.mrb[12].mxu0 %vm265_vm2, %v769_v13 }
0x1050   :  { %1940 = vmatprep.mubr.msk.f32.mxu0 %vm2300_vm1, %v2297_v0 }
0x1122   :  { %v838_v14 = vpop.f32.mrb[12].mxu0 }
0x1123   :  { %v2094_v15 = vadd.f32 %v838_v14, %v2433_v12  ;;  %v1804_v16 = vpop.f32.mrb[13].mxu0 }
0x1125   :  { %2171 = vtanh.f32 %v2094_v15  ;;  %v1632_v18 = vmul.f32 -1.442695, %v2094_v15 }
0x1127   :  { %2173 = vpow2.f32 %v1632_v18  ;;  %v989_v18 = vld [vmem:[%s2692_s4 + $0x20] sm:$0xff] }
0x112f   :  { %v2172_v17 = vpop.eup %2171 }
0x1130   :  { %852 = vrot.lane.b32.xlu0 %v2172_v17, %s2298_s1  ;;  %v986_v17 = vld [vmem:[%s2692_s4 + $0x8] sm:$0xff] }
0x1131   :  { %v2174_v19 = vpop.eup %2173 }
0x1132   :  { %v846_v20 = vadd.f32 1.0, %v2174_v19  ;;  %v985_v19 = vld [vmem:[%s2692_s4] sm:$0xff] }
0x1134   :  { %2175 = vrcp.f32 %v846_v20  ;;  %v2003_v20 = vpack.c.bf16 %v989_v18, %v986_v17  ;;  %v1335_v18 = vld [vmem:[#allocation7 + $0x70] sm:$0xff] }
0x113e   :  { %v2176_v21 = vpop.eup %2175 }
0x113f   :  { %v850_v24 = vmul.f32 %v2176_v21, %v760_v5  ;;  %v2001_v5 = vpack.c.bf16 %v1008_v31, %v1005_v3  ;;  %v1326_v3 = vld [vmem:[#allocation7 + $0x28] sm:$0xff] }
0x11a2   :  { %v853_v22 = vpop.permute.xlu0 %852 }
0x11a3   :  { %v855_v23 = vmul.f32 %v2176_v21, %v853_v22  ;;  %v992_v22 = vld [vmem:[%s2692_s4 + $0x38] sm:$0xff] }
0x11a5   :  { %857 = vrot.lane.b32.xlu1 %v855_v23, %s2302_s10  ;;  %v995_v23 = vld [vmem:[%s2692_s4 + $0x50] sm:$0xff] }
0x1217   :  { %v858_v25 = vpop.permute.xlu1 %857 }
0x1218   :  { %v2561_v28 = vadd.f32 %v858_v25, %v850_v24  ;;  %v2007_v25 = vpack.c.bf16 %v995_v23, %v992_v22  ;;  %v1522_v22 = vld [vmem:[#allocation7 + $0x158] sm:$0xff] }
0x121a   :  { %2177 = vtanh.f32 %v2561_v28 }
0x121b   :  { %2179 = vtanh.f32 %v238_v33 }
0x121c   :  { %2181 = vpow2.f32 %v1635_v37 }
0x1224   :  { %v2178_v29 = vpop.eup %2177 }
0x1225   :  { %863 = vrot.lane.b32.xlu0 %v2178_v29, %s2298_s1  ;;  %v2180_v36 = vpop.eup %2179  ;;  %v994_v29 = vld [vmem:[%s2692_s4 + $0x48] sm:$0xff] }
0x1226   :  { %v2182_v38 = vpop.eup %2181 }
0x1227   :  { %v970_v39 = vadd.f32 1.0, %v2182_v38  ;;  %v1511_v38 = vld [vmem:[#allocation7 + $0x100] sm:$0xff] }
0x1229   :  { %2183 = vrcp.f32 %v970_v39  ;;  %v1512_v39 = vld [vmem:[#allocation7 + $0x108] sm:$0xff] }
0x1233   :  { %v2184_v11 = vpop.eup %2183 }
0x1297   :  { %v864_v34 = vpop.permute.xlu0 %863 }
0x1298   :  { %v866_v35 = vmul.f32 %v2176_v21, %v864_v34  ;;  %v988_v21 = vld [vmem:[%s2692_s4 + $0x18] sm:$0xff] }
0x1299   :  { %v2005_v24 = vpack.c.bf16 %v988_v21, %v985_v19  ;;  %v1336_v19 = vld [vmem:[#allocation7 + $0x78] sm:$0xff]  ;;  %v1521_v21 = vld [vmem:[#allocation7 + $0x150] sm:$0xff] }
0x129a   :  { %868 = vrot.lane.b32.xlu1 %v866_v35, %s2302_s10  ;;  %v2081_v23 = vpack.c.bf16 %v1522_v22, %v1521_v21 }
0x129e   :  { %975 = vrot.lane.b32.xlu1 %v2180_v36, %s2298_s1 }
0x130c   :  { %v869_v42 = vpop.permute.xlu1 %868 }
0x130d   :  { %1814 = vmatmul.mubr.msk.f32.vlgmr.msra.gmra.mrb[0].mxu1 %vm265_vm2, %v869_v42  ;;  %v2066_v42 = vpack.c.bf16 %v1512_v39, %v1511_v38  ;;  %v1417_v38 = vld [vmem:[#allocation7 + $0x88] sm:$0xff] }
0x130e   :  { %1078 = vmatprep.mubr.f32.mxu1 %v2297_v0  ;;  %1992 = vmatpush1.bf16.msra.mxu1 %v1991_v52  ;;  %v2078_v52 = vpack.c.bf16 %v1520_v51, %v1519_v50 }
0x130f   :  { %1994 = vmatprep.subr.bf16.mxu1 %v1993_v53  ;;  %2067 = vmatpush3.bf16.msra.mxu0 %v2066_v42  ;;  %v987_v53 = vld [vmem:[%s2692_s4 + $0x10] sm:$0xff] }
0x1310   :  { %v976_v41 = vpop.permute.xlu1 %975  ;;  %2068 = vmatprep.subr.bf16.mxu0 %v2299_v26  ;;  %v2012_v55 = vpack.c.bf16 %v990_v54, %v987_v53  ;;  %v1422_v53 = vld [vmem:[#allocation7 + $0xb0] sm:$0xff]  ;;  %v1423_v54 = vld [vmem:[#allocation7 + $0xb8] sm:$0xff] }
0x1311   :  { %v978_v43 = vmul.f32 %v2184_v11, %v976_v41  ;;  %v1514_v41 = vld [vmem:[#allocation7 + $0x118] sm:$0xff] }
0x1312   :  { %1996 = vmatpush1.bf16.msra.mxu1 %v1995_v56  ;;  %v993_v56 = vld [vmem:[%s2692_s4 + $0x40] sm:$0xff] }
0x1313   :  { %2185 = vtanh.f32 %v978_v43  ;;  %1997 = vmatprep.subr.bf16.mxu1 %v2299_v26 }
0x131d   :  { %v2186_v44 = vpop.eup %2185 }
0x131e   :  { %981 = vrot.lane.b32.xlu1 %v2186_v44, %s2301_s12  ;;  %v1515_v44 = vld [vmem:[#allocation7 + $0x120] sm:$0xff] }
0x131f   :  { %v2072_v46 = vpack.c.bf16 %v1516_v45, %v1515_v44  ;;  %v1419_v44 = vld [vmem:[#allocation7 + $0x98] sm:$0xff]  ;;  %v1313_v45 = vsub.s32 2, %v2425_v9  ;;  %v1642_v9 = vld [vmem:[%s2696_s8 + $0x2] ss:$0 sm:$0xff] }
0x1390   :  { %v982_v57 = vpop.permute.xlu1 %981 }
0x1391   :  { %v984_v58 = vmul.f32 %v2184_v11, %v982_v57  ;;  %v1513_v11 = vld [vmem:[#allocation7 + $0x110] sm:$0xff] }
0x1392   :  { %v2069_v43 = vpack.c.bf16 %v1514_v41, %v1513_v11  ;;  %v996_v57 = vld [vmem:[%s2692_s4 + $0x58] sm:$0xff] }
0x1393   :  { %1010 = vrot.lane.b32.xlu1 %v984_v58, %s2302_s10 }
0x1394   :  { %2070 = vmatpush3.bf16.msra.mxu0 %v2069_v43  ;;  %v1418_v43 = vld [vmem:[#allocation7 + $0x90] sm:$0xff] }
0x1395   :  { %2071 = vmatprep.subr.bf16.mxu0 %v2299_v26 }
0x1398   :  { %2073 = vmatpush3.bf16.msra.mxu0 %v2072_v46  ;;  %v2045_v46 = vpack.c.bf16 %v1419_v44, %v1418_v43 }
0x1399   :  { %2074 = vmatprep.subr.bf16.mxu0 %v2299_v26 }
0x139c   :  { %2076 = vmatpush3.bf16.msra.mxu0 %v2075_v49 }
0x139d   :  { %2077 = vmatprep.subr.bf16.mxu0 %v2299_v26 }
0x13a0   :  { %2079 = vmatpush3.bf16.msra.mxu0 %v2078_v52 }
0x13a1   :  { %2080 = vmatprep.subr.bf16.mxu0 %v2299_v26 }
0x13a4   :  { %2082 = vmatpush3.bf16.msra.mxu0 %v2081_v23 }
0x13a5   :  { %2083 = vmatprep.subr.bf16.mxu0 %v2299_v26 }
0x13e0   :  { %v938_v60 = vpop.f32.mrb[0].mxu1 }
0x13e1   :  { %v942_v61 = vadd.f32 %v938_v60, %v236_v59  ;;  %v1815_v62 = vpop.f32.mrb[1].mxu1  ;;  %v2015_v59 = vpack.c.bf16 %v996_v57, %v993_v56  ;;  %v1321_v60 = vld [vmem:[#allocation7] sm:$0xff]  ;;  %v2051_v56 = vpack.c.bf16 %v1423_v54, %v1422_v53  ;;  %v1425_v57 = vld [vmem:[#allocation7 + $0xc8] sm:$0xff] }
0x13e3   :  { %2187 = vtanh.f32 %v942_v61  ;;  %v1634_v12 = vmul.f32 -1.442695, %v942_v61  ;;  %v1322_v61 = vld [vmem:[#allocation7 + $0x8] sm:$0xff] }
0x13e4   :  { %v2018_v62 = vpack.c.bf16 %v1322_v61, %v1321_v60  ;;  %v1427_v60 = vld [vmem:[#allocation7 + $0xd8] sm:$0xff]  ;;  %v1428_v61 = vld [vmem:[#allocation7 + $0xe0] sm:$0xff] }
0x13e5   :  { %2189 = vpow2.f32 %v1634_v12 }
0x13ed   :  { %v2188_v27 = vpop.eup %2187 }
0x13ee   :  { %952 = vrot.lane.b32.xlu0 %v2188_v27, %s2298_s1  ;;  %v1323_v27 = vld [vmem:[#allocation7 + $0x10] sm:$0xff] }
0x13ef   :  { %v2190_v40 = vpop.eup %2189  ;;  %v2021_v1 = vpack.c.bf16 %v1324_v63, %v1323_v27  ;;  %v1430_v63 = vld [vmem:[#allocation7 + $0xf0] sm:$0xff] }
0x13f0   :  { %v946_v6 = vadd.f32 1.0, %v2190_v40  ;;  %v1329_v40 = vld [vmem:[#allocation7 + $0x40] sm:$0xff] }
0x13f2   :  { %2191 = vrcp.f32 %v946_v6  ;;  %v1330_v6 = vld [vmem:[#allocation7 + $0x48] sm:$0xff] }
0x13fc   :  { %v2192_v7 = vpop.eup %2191 }
0x13fd   :  { %v950_v14 = vmul.f32 %v2192_v7, %v2561_v28  ;;  %v991_v28 = vld [vmem:[%s2692_s4 + $0x30] sm:$0xff] }
0x13fe   :  { %v2009_v32 = vpack.c.bf16 %v994_v29, %v991_v28  ;;  %v1525_v29 = vld [vmem:[#allocation7 + $0x170] sm:$0xff] }
0x1405   :  { %v1011_v4 = vpop.permute.xlu1 %1010 }
0x1406   :  { %1636 = vmatmul.mubr.msk.f32.vlgmr.msra.gmra.mrb[2].mxu1 %vm265_vm2, %v1011_v4 }
0x1407   :  { %1999 = vmatpush3.bf16.msra.mxu1 %v1998_v2  ;;  %1824 = vmatprep.mubr.msk.f32.mxu1 %vm2300_vm1, %v2297_v0  ;;  %v1325_v2 = vld [vmem:[#allocation7 + $0x20] sm:$0xff] }
0x1408   :  { %2000 = vmatprep.subr.bf16.mxu1 %v2299_v26  ;;  %v2024_v31 = vpack.c.bf16 %v1326_v3, %v1325_v2 }
0x140b   :  { %2002 = vmatpush3.bf16.msra.mxu1 %v2001_v5  ;;  %v1328_v5 = vld [vmem:[#allocation7 + $0x38] sm:$0xff] }
0x140c   :  { %2004 = vmatprep.subr.bf16.mxu1 %v2003_v20  ;;  %v2039_v20 = vpack.c.bf16 %v1336_v19, %v1335_v18 }
0x140e   :  { %1825 = vmatmul.mubr.msk.f32.vlgmr.msra.gmra.mrb[4].mxu1 %vm265_vm2, %v1011_v4  ;;  %v1327_v4 = vld [vmem:[#allocation7 + $0x30] sm:$0xff] }
0x140f   :  { %1224 = vmatprep.mubr.f32.mxu1 %v2297_v0  ;;  %2006 = vmatpush1.bf16.msra.mxu1 %v2005_v24  ;;  %v2027_v12 = vpack.c.bf16 %v1328_v5, %v1327_v4  ;;  %v1523_v24 = vld [vmem:[#allocation7 + $0x160] sm:$0xff]  ;;  %v1640_v4 = vld [vmem:[%s2696_s8] ss:$0 sm:$0xff] }
0x1410   :  { %2008 = vmatprep.subr.bf16.mxu1 %v2007_v25  ;;  %v1524_v25 = vld [vmem:[#allocation7 + $0x168] sm:$0xff] }
0x1411   :  { %v2084_v28 = vpack.c.bf16 %v1524_v25, %v1523_v24 }
0x1413   :  { %2010 = vmatpush1.bf16.msra.mxu1 %v2009_v32  ;;  %2085 = vmatpush3.bf16.msra.mxu0 %v2084_v28  ;;  %v1526_v32 = vld [vmem:[#allocation7 + $0x178] sm:$0xff] }
0x1414   :  { %2011 = vmatprep.subr.bf16.mxu1 %v2299_v26  ;;  %2086 = vmatprep.subr.bf16.mxu0 %v2299_v26 }
0x1460   :  { %v953_v8 = vpop.permute.xlu0 %952 }
0x1461   :  { %v955_v13 = vmul.f32 %v2192_v7, %v953_v8  ;;  %v1331_v8 = vld [vmem:[#allocation7 + $0x50] sm:$0xff] }
0x1463   :  { %957 = vrot.lane.b32.xlu0 %v955_v13, %s2302_s10  ;;  %v1332_v13 = vld [vmem:[#allocation7 + $0x58] sm:$0xff] }
0x14d5   :  { %v958_v15 = vpop.permute.xlu0 %957 }
0x14d6   :  { %v960_v16 = vadd.f32 %v958_v15, %v950_v14  ;;  %v2033_v14 = vpack.c.bf16 %v1332_v13, %v1331_v8  ;;  %v1333_v15 = vld [vmem:[#allocation7 + $0x60] sm:$0xff] }
0x14d8   :  { %2193 = vtanh.f32 %v960_v16  ;;  %v1334_v16 = vld [vmem:[#allocation7 + $0x68] sm:$0xff] }
0x14d9   :  { %v2036_v17 = vpack.c.bf16 %v1334_v16, %v1333_v15 }
0x14e1   :  { %v2612_v33 = vpop.f32.mrb[4].mxu1 }
0x14e2   :  { %v2194_v34 = vpop.eup %2193  ;;  %v1826_v35 = vpop.f32.mrb[5].mxu1 }
0x14e3   :  { %963 = vrot.lane.b32.xlu0 %v2194_v34, %s2298_s1  ;;  %v2087_v34 = vpack.c.bf16 %v1526_v32, %v1525_v29  ;;  %v1301_v35 = vld [vmem:[%s2694_s6] sm:$0x7] }
0x14e4   :  { %v1314_v48 = vrot.slane %v1301_v35, %v1313_v45  ;;  %v1310_v3 = vrot.slane %v1301_v35, %v105_v30 }
0x14e5   :  { %2088 = vmatpush3.bf16.msra.mxu0 %v2087_v34 }
0x1555   :  { %v964_v36 = vpop.permute.xlu0 %963 }
0x1556   :  { %v966_v37 = vmul.f32 %v2192_v7, %v964_v36  ;;  %v2030_v7 = vpack.c.bf16 %v1330_v6, %v1329_v40  ;;  %v1306_v36 = vrot.slane %v1301_v35, %v101_v10  ;;  %v1421_v10 = vld [vmem:[#allocation7 + $0xa8] sm:$0xff] }
0x1557   :  { %v2048_v50 = vpack.c.bf16 %v1421_v10, %v1420_v47 }
0x1558   :  { %1156 = vrot.lane.b32.xlu0 %v966_v37, %s2302_s10  ;;  %v1416_v37 = vld [vmem:[#allocation7 + $0x80] sm:$0xff] }
0x1559   :  { %v2042_v42 = vpack.c.bf16 %v1417_v38, %v1416_v37 }
0x15ca   :  { %v1157_v58 = vpop.permute.xlu0 %1156 }
0x15cb   :  { %1638 = vmatmul.mubr.msk.f32.vlgmr.msra.gmra.mrb[2].mxu1 %vm265_vm2, %v1157_v58 }
0x15cc   :  { %2013 = vmatpush3.bf16.msra.mxu1 %v2012_v55  ;;  %1835 = vmatprep.mubr.msk.f32.mxu1 %vm2300_vm1, %v2297_v0 }
0x15cd   :  { %2014 = vmatprep.subr.bf16.mxu1 %v2299_v26 }
0x15d0   :  { %2016 = vmatpush3.bf16.msra.mxu1 %v2015_v59  ;;  %v1426_v59 = vld [vmem:[#allocation7 + $0xd0] sm:$0xff] }
0x15d1   :  { %2017 = vmatprep.subr.bf16.mxu1 %v2299_v26 }
0x15d3   :  { %1836 = vmatmul.mubr.msk.f32.vlgmr.msra.gmra.mrb[6].mxu1 %vm265_vm2, %v1157_v58 }
0x15d4   :  { %2019 = vmatpush3.bf16.msra.mxu1 %v2018_v62  ;;  %1870 = vmatprep.mubr.msk.f32.mxu1 %vm2300_vm1, %v2297_v0  ;;  %v1429_v62 = vld [vmem:[#allocation7 + $0xe8] sm:$0xff] }
0x15d5   :  { %2020 = vmatprep.subr.bf16.mxu1 %v2299_v26  ;;  %v2060_v27 = vpack.c.bf16 %v1429_v62, %v1428_v61 }
0x15d8   :  { %2022 = vmatpush3.bf16.msra.mxu1 %v2021_v1  ;;  %v1431_v1 = vld [vmem:[#allocation7 + $0xf8] sm:$0xff] }
0x15d9   :  { %2023 = vmatprep.subr.bf16.mxu1 %v2299_v26  ;;  %v2063_v2 = vpack.c.bf16 %v1431_v1, %v1430_v63 }
0x15dc   :  { %2025 = vmatpush3.bf16.msra.mxu1 %v2024_v31 }
0x15dd   :  { %2026 = vmatprep.subr.bf16.mxu1 %v2299_v26 }
0x15e0   :  { %2028 = vmatpush3.bf16.msra.mxu1 %v2027_v12 }
0x15e1   :  { %2029 = vmatprep.subr.bf16.mxu1 %v2299_v26 }
0x15e4   :  { %2031 = vmatpush3.bf16.msra.mxu1 %v2030_v7  ;;  %v1641_v7 = vld [vmem:[%s2696_s8 + $0x1] ss:$0 sm:$0xff] }
0x15e5   :  { %2032 = vmatprep.subr.bf16.mxu1 %v2299_v26 }
0x15e8   :  { %2034 = vmatpush3.bf16.msra.mxu1 %v2033_v14 }
0x15e9   :  { %2035 = vmatprep.subr.bf16.mxu1 %v2299_v26 }
0x15ec   :  { %2037 = vmatpush3.bf16.msra.mxu1 %v2036_v17 }
0x15ed   :  { %2038 = vmatprep.subr.bf16.mxu1 %v2299_v26 }
0x15f0   :  { %2040 = vmatpush3.bf16.msra.mxu1 %v2039_v20 }
0x15f1   :  { %2041 = vmatprep.subr.bf16.mxu1 %v2299_v26 }
0x169e   :  { %v1226_v39 = vpop.f32.mrb[2].mxu1 }
0x169f   :  { %v1318_v11 = vadd.f32 %v1306_v36, %v1226_v39  ;;  %v1228_v41 = vpop.f32.mrb[3].mxu1 }
0x16a0   :  { %v1319_v31 = vadd.f32 %v1310_v3, %v1228_v41 }
0x16a1   :  { %1871 = vmatmul.mubr.f32.vlgmr.msra.gmra.mrb[8].mxu1 %v1318_v11 }
0x16a2   :  { %2043 = vmatpush3.bf16.msra.mxu1 %v2042_v42  ;;  %1905 = vmatprep.mubr.msk.f32.mxu1 %vm2300_vm1, %v2297_v0  ;;  %v1424_v0 = vld [vmem:[#allocation7 + $0xc0] sm:$0xff] }
0x16a3   :  { %2044 = vmatprep.subr.bf16.mxu1 %v2299_v26  ;;  %v2054_v58 = vpack.c.bf16 %v1425_v57, %v1424_v0 }
0x16a6   :  { %v1297_v49 = vpop.f32.mrb[6].mxu1  ;;  %2046 = vmatpush3.bf16.msra.mxu1 %v2045_v46 }
0x16a7   :  { %v1298_v51 = vadd.f32 %v1297_v49, %v2612_v33  ;;  %v1837_v52 = vpop.f32.mrb[7].mxu1  ;;  %2047 = vmatprep.subr.bf16.mxu1 %v2299_v26  ;;  %v2057_v33 = vpack.c.bf16 %v1427_v60, %v1426_v59 }
0x16a9   :  { %v1320_v55 = vadd.f32 %v1314_v48, %v1298_v51 }
0x16aa   :  { %2049 = vmatpush3.bf16.msra.mxu1 %v2048_v50 }
0x16ab   :  { %1941 = vmatmul.mubr.f32.vlgmr.msra.gmra.mrb[16].mxu0 %v1320_v55  ;;  %2050 = vmatprep.subr.bf16.mxu1 %v2299_v26 }
0x16ae   :  { %2052 = vmatpush3.bf16.msra.mxu1 %v2051_v56 }
0x16af   :  { %2053 = vmatprep.subr.bf16.mxu1 %v2299_v26 }
0x16b2   :  { %2055 = vmatpush3.bf16.msra.mxu1 %v2054_v58 }
0x16b3   :  { %2056 = vmatprep.subr.bf16.mxu1 %v2299_v26 }
0x16b6   :  { %2058 = vmatpush3.bf16.msra.mxu1 %v2057_v33 }
0x16b7   :  { %2059 = vmatprep.subr.bf16.mxu1 %v2299_v26 }
0x16ba   :  { %2061 = vmatpush3.bf16.msra.mxu1 %v2060_v27 }
0x16bb   :  { %2062 = vmatprep.subr.bf16.mxu1 %v2299_v26 }
0x16be   :  { %2064 = vmatpush3.bf16.msra.mxu1 %v2063_v2 }
0x16c1   :  { %1906 = vmatmul.mubr.f32.vlgmr.msra.gmra.mrb[10].mxu1 %v1319_v31 }
0x1774   :  { %v1410_v5 = vpop.f32.mrb[8].mxu1 }
0x1775   :  { %v1411_v12 = vadd.f32 %v1640_v4, %v1410_v5  ;;  %v1872_v40 = vpop.f32.mrb[9].mxu1 }
0x1777   :  { %1414 = vst [vmem:[%s2697_s9] sm:$0xff] %v1411_v12 }
0x177e   :  { %v1600_v30 = vpop.f32.mrb[16].mxu0 }
0x177f   :  { %v1601_v26 = vadd.f32 %v1642_v9, %v1600_v30  ;;  %v1942_v6 = vpop.f32.mrb[17].mxu0 }
0x1781   :  { %1604 = vst [vmem:[%s2697_s9 + $0x10] sm:$0xff] %v1601_v26 }
0x1794   :  { %v1505_v8 = vpop.f32.mrb[10].mxu1 }
0x1795   :  { %v1506_v13 = vadd.f32 %v1641_v7, %v1505_v8  ;;  %v1907_v14 = vpop.f32.mrb[11].mxu1 }
0x1797   :  { %1509 = vst [vmem:[%s2697_s9 + $0x8] sm:$0xff] %v1506_v13 }
0x1798   :  { %1609 = vsyncpa [#allocation3], 1 }
0x1799   :  { %1610 = vsyncpa [#allocation5], 1 }
0x179a   :  { %1611 = vsyncpa [#allocation8], 1 }

</bundles_post_ra>
